<compile_context>
chip_gen: v7x
topology: tpu7x:2x2x1
jax: 0.10.0
libtpu: 0.0.40
codegen_flags: <defaults>
</compile_context>

<pallas_src>
import functools

import jax
import jax.numpy as jnp
from jax.experimental import pallas as pl
from jax.experimental.pallas import tpu as pltpu


def _round_up(x: int, m: int) -> int:
    return (x + m - 1) // m * m


def _resblock_kernel(x_ref, w_ref, b_ref, o_ref, *, tf: int):
    # x_ref : (TB, Fp)  f32   batch-row tile, full (padded) feature width
    # w_ref : (Fp, TF)  bf16  (in, out) weight slab for this output-feature tile
    # b_ref : (1, TF)   f32
    # o_ref : (TB, TF)  f32
    j = pl.program_id(1)

    x_f32 = x_ref[...]                                   # keep f32 copy for the residual
    acc = jnp.dot(x_f32.astype(jnp.bfloat16), w_ref[...],
                  preferred_element_type=jnp.float32)    # single fused MXU matmul
    z = jnp.tanh(acc + b_ref[...])                       # bias + tanh in f32 (EUP)

    off = pl.multiple_of(j * tf, tf)                     # lane-aligned residual slice
    x_res = x_ref[:, pl.ds(off, tf)]                     # (TB, TF) f32
    o_ref[...] = (x_res + z).astype(o_ref.dtype)


@jax.jit
def resblock_forward(x, w_oi, b):
    """x: (B, F) f32. w_oi: (F, F) PyTorch nn.Linear layout (out, in). b: (F,).

    Returns x + tanh(x @ w_oi.T + b), shape (B, F).
    """
    B, F = x.shape

    # Lane/sublane-dense padded sizes.
    Fp = _round_up(F, 128)
    Bp = _round_up(B, 8)

    # Tile sizes: TB divides Bp (Bp is a multiple of 8), TF divides Fp (multiple of 128).
    TB = next(t for t in (512, 256, 128, 64, 32, 16, 8) if Bp % t == 0)
    TF = next(t for t in (512, 256, 128) if Fp % t == 0)

    # Glue: pad to lane-dense shapes; weight -> (in, out) layout, bf16 for the MXU.
    x_p = jnp.pad(x, ((0, Bp - B), (0, Fp - F)))
    w_io = jnp.pad(jnp.transpose(w_oi), ((0, Fp - F), (0, Fp - F))).astype(jnp.bfloat16)
    b_p = jnp.pad(b, ((0, Fp - F),)).reshape(1, Fp).astype(jnp.float32)

    out_p = pl.pallas_call(
        functools.partial(_resblock_kernel, tf=TF),
        out_shape=jax.ShapeDtypeStruct((Bp, Fp), x.dtype),
        grid_spec=pltpu.PrefetchScalarGridSpec(
            num_scalar_prefetch=0,
            grid=(Bp // TB, Fp // TF),
            in_specs=[
                pl.BlockSpec((TB, Fp), lambda i, j: (i, 0)),   # activations
                pl.BlockSpec((Fp, TF), lambda i, j: (0, j)),   # weights (in, out)
                pl.BlockSpec((1, TF), lambda i, j: (0, j)),    # bias
            ],
            out_specs=pl.BlockSpec((TB, TF), lambda i, j: (i, j)),
        ),
        compiler_params=pltpu.CompilerParams(
            dimension_semantics=("parallel", "parallel")),
    )(x_p, w_io, b_p)

    return out_p[:B, :F]


def reference_forward(x, w_oi, b):
    """Pure-JAX reference mirroring the PyTorch forward (f32)."""
    y = x @ jnp.transpose(w_oi) + b
    return x + jnp.tanh(y)


if __name__ == "__main__":
    # Small shapes consistent with the module: batch=2, features=32.
    B, F = 2, 32

    key = jax.random.PRNGKey(0)
    kx, kw, kb = jax.random.split(key, 3)

    x = jax.random.normal(kx, (B, F), jnp.float32)
    # nn.Linear-style deterministic init.
    bound = 1.0 / (F ** 0.5)
    w = jax.random.uniform(kw, (F, F), jnp.float32, -bound, bound)   # (out, in)
    b = jax.random.uniform(kb, (F,), jnp.float32, -bound, bound)

    out = resblock_forward(x, w, b)
    out = jax.block_until_ready(out)

    ref = reference_forward(x, w, b)
    assert out.shape == (B, F)
    max_err = jnp.max(jnp.abs(out - ref))
    # Matmul operands are bf16 (f32 accumulate), so allow bf16-level tolerance.
    assert jnp.allclose(out, ref, atol=2e-2, rtol=2e-2), f"max abs err = {max_err}"

    print("KERNEL_OK")
</pallas_src>

<mosaic_0001>
module attributes {stable_mosaic.version = 11 : i64} {
  func.func @_resblock_kernel(%arg0: i32, %arg1: i32, %arg2: memref<8x128xf32, #tpu.memory_space<vmem>>, %arg3: memref<128x128xbf16, #tpu.memory_space<vmem>>, %arg4: memref<1x128xf32, #tpu.memory_space<vmem>>, %arg5: memref<8x128xf32, #tpu.memory_space<vmem>>) attributes {dimension_semantics = [#tpu.dimension_semantics<parallel>, #tpu.dimension_semantics<parallel>], iteration_bounds = array<i64: 1, 1>, scalar_prefetch = 0 : i64, scratch_operands = 0 : i64, tpu.core_type = #tpu.core_type<tc>, window_params = [{transform_indices = @transform_0, window_bounds = array<i64: 8, 128>}, {transform_indices = @transform_1, window_bounds = array<i64: 128, 128>}, {transform_indices = @transform_2, window_bounds = array<i64: 1, 128>}, {transform_indices = @transform_3, window_bounds = array<i64: 8, 128>}]} {
    %c0 = arith.constant 0 : index
    %c0_0 = arith.constant 0 : index
    %0 = vector.load %arg2[%c0, %c0_0] : memref<8x128xf32, #tpu.memory_space<vmem>>, vector<8x128xf32>
    %1 = arith.truncf %0 : vector<8x128xf32> to vector<8x128xbf16>
    %c0_1 = arith.constant 0 : index
    %c0_2 = arith.constant 0 : index
    %2 = vector.load %arg3[%c0_1, %c0_2] : memref<128x128xbf16, #tpu.memory_space<vmem>>, vector<128x128xbf16>
    %cst = arith.constant dense<0.000000e+00> : vector<8x128xf32>
    %3 = tpu.matmul %1, %2, %cst {dimension_numbers = #tpu.dot_dimension_numbers<[1], [0], [0], [1], [0, 0, 1, 1], [], []>} : vector<8x128xbf16>, vector<128x128xbf16>, vector<8x128xf32> -> vector<8x128xf32>
    %c0_3 = arith.constant 0 : index
    %c0_4 = arith.constant 0 : index
    %4 = vector.load %arg4[%c0_3, %c0_4] : memref<1x128xf32, #tpu.memory_space<vmem>>, vector<1x128xf32>
    %5 = vector.broadcast %4 : vector<1x128xf32> to vector<8x128xf32>
    %6 = arith.addf %3, %5 : vector<8x128xf32>
    %7 = math.tanh %6 : vector<8x128xf32>
    %c128_i32 = arith.constant 128 : i32
    %8 = arith.muli %arg1, %c128_i32 : i32
    %9 = tpu.assume_multiple %8, 128 : i32
    %c0_5 = arith.constant 0 : index
    %10 = arith.index_cast %9 : i32 to index
    %11 = vector.load %arg2[%c0_5, %10] : memref<8x128xf32, #tpu.memory_space<vmem>>, vector<8x128xf32>
    %12 = arith.addf %11, %7 : vector<8x128xf32>
    %c0_6 = arith.constant 0 : index
    %c0_7 = arith.constant 0 : index
    %13 = vector.load %arg5[%c0_6, %c0_7] : memref<8x128xf32, #tpu.memory_space<vmem>>, vector<8x128xf32>
    tpu.vector_store %arg5[%c0_6, %c0_7], %12 {strides = array<i32>} : memref<8x128xf32, #tpu.memory_space<vmem>>, vector<8x128xf32>,
    return
  }
  func.func @transform_0(%arg0: i32, %arg1: i32) -> (i32, i32) {
    %c0_i32 = arith.constant 0 : i32
    %c0_i32_0 = arith.constant 0 : i32
    return %arg0, %c0_i32 : i32, i32
  }
  func.func @transform_1(%arg0: i32, %arg1: i32) -> (i32, i32) {
    %c0_i32 = arith.constant 0 : i32
    %c0_i32_0 = arith.constant 0 : i32
    return %c0_i32, %arg1 : i32, i32
  }
  func.func @transform_2(%arg0: i32, %arg1: i32) -> (i32, i32) {
    %c0_i32 = arith.constant 0 : i32
    %c0_i32_0 = arith.constant 0 : i32
    return %c0_i32, %arg1 : i32, i32
  }
  func.func @transform_3(%arg0: i32, %arg1: i32) -> (i32, i32) {
    %c0_i32 = arith.constant 0 : i32
    return %arg0, %arg1 : i32, i32
  }
}

</mosaic_0001>

<bundles_post_ra>
// kernel: resblock_forward.1
= control target key start
LH: loop header
LB: loop body
LE: loop exit
PB: predicated region body
PF: predicated region fallthrough
CT: control target
= control target key end

     0   :  { %v191_v0 = vmov 0.0   ;;  %vm192_vm0 = vmmov 0   ;;  %s246_s1 = inlined_call_operand.vmem [shape: bf16[128,128], index: 1, kind: input, shape index: {}]   ;;  %s247_s0 = inlined_call_operand.vmem [shape: f32[8,128], index: 0, kind: input, shape index: {}]   ;;  %s248_s2 = inlined_call_operand.vmem [shape: f32[1,128], index: 2, kind: input, shape index: {}]   ;;  %s249_s3 = inlined_call_operand.vmem [shape: f32[8,128], index: 3, kind: output, shape index: {}]  }
   0x1   :  { %159 = vmatprep.subr.bf16.mxu0 %v191_v0  ;;  %v181_v1 = vld [vmem:[%s246_s1] sm:$0xff]   ;;  %175 = vmatprep.mubr.msk.bf16.mxu0 %vm192_vm0, %v191_v0  ;;  %v182_v2 = vld [vmem:[%s246_s1 + $0x8] sm:$0xff]   ;;  %v183_v3 = vld [vmem:[%s246_s1 + $0x10] sm:$0xff]  }
   0x2   :  { %160 = vmatpush3.bf16.msra.mxu0 %v181_v1  ;;  %v184_v4 = vld [vmem:[%s246_s1 + $0x18] sm:$0xff]   ;;  %v185_v5 = vld [vmem:[%s246_s1 + $0x20] sm:$0xff]   ;;  %v186_v6 = vld [vmem:[%s246_s1 + $0x28] sm:$0xff]  }
   0x3   :  { %161 = vmatprep.subr.bf16.mxu0 %v191_v0  ;;  %v187_v7 = vld [vmem:[%s246_s1 + $0x30] sm:$0xff]   ;;  %v188_v8 = vld [vmem:[%s246_s1 + $0x38] sm:$0xff]   ;;  %v15_v9 = vld [vmem:[%s247_s0] sm:$0xff] }
   0x4   :  { %v16_v10 = vpack.c.bf16 %v15_v9, %v15_v9  ;;  %v141_v11 = vld [vmem:[%s248_s2] ss:$0 sm:$0xff] }
   0x6   :  { %162 = vmatpush3.bf16.msra.mxu0 %v182_v2 }
   0x7   :  { %163 = vmatprep.subr.bf16.mxu0 %v191_v0 }
   0xa   :  { %164 = vmatpush3.bf16.msra.mxu0 %v183_v3 }
   0xb   :  { %165 = vmatprep.subr.bf16.mxu0 %v191_v0 }
   0xe   :  { %166 = vmatpush3.bf16.msra.mxu0 %v184_v4 }
   0xf   :  { %167 = vmatprep.subr.bf16.mxu0 %v191_v0 }
  0x12   :  { %168 = vmatpush3.bf16.msra.mxu0 %v185_v5 }
  0x13   :  { %169 = vmatprep.subr.bf16.mxu0 %v191_v0 }
  0x16   :  { %170 = vmatpush3.bf16.msra.mxu0 %v186_v6 }
  0x17   :  { %171 = vmatprep.subr.bf16.mxu0 %v191_v0 }
  0x1a   :  { %172 = vmatpush3.bf16.msra.mxu0 %v187_v7 }
  0x1b   :  { %173 = vmatprep.subr.bf16.mxu0 %v191_v0 }
  0x1e   :  { %174 = vmatpush3.bf16.msra.mxu0 %v188_v8 }
  0x21   :  { %176 = vmatmul.mubr.bf16.vlgmr.msra.gmra.mrb[0].mxu0 %v16_v10 }
  0xf4   :  { %v122_v12 = vpop.f32.mrb[0].mxu0 }
  0xf5   :  { %v123_v13 = vadd.f32 %v141_v11, %v122_v12  ;;  %v177_v14 = vpop.f32.mrb[1].mxu0 }
  0xf6   :  { %v125_v15 = vpop.f32.mrb[2].mxu0 }
  0xf7   :  { %189 = vtanh.f32 %v123_v13  ;;  %v178_v16 = vpop.f32.mrb[3].mxu0 }
 0x101   :  { %v190_v17 = vpop.eup %189 }
 0x102   :  { %v134_v18 = vadd.f32 %v190_v17, %v15_v9 }
 0x104   :  { %135 = vst [vmem:[%s249_s3] sm:$0xff] %v134_v18 }

</bundles_post_ra>
